<compile_context>
chip_gen: v6e
topology: v6e:2x2x1
jax: 0.10.0
libtpu: 0.0.40
codegen_flags: <defaults>
</compile_context>

<pallas_src>
import numpy as np
import jax
import jax.numpy as jnp
from jax import lax
from jax.experimental import pallas as pl
from jax.experimental.pallas import tpu as pltpu


_LANES = 128
_SUBLANES = 16          # block rows kept a multiple of 16 -> valid for f32 and int16 tiles
_MAX_BLOCK_ROWS = 2048  # ~1 MiB f32 per stream per block, well past the HBM-roofline knee
_MAX_UNROLL = 8         # static unroll cap for the learning-cell chunk loop


def _round_up(x, m):
    return ((x + m - 1) // m) * m


def _fill_kernel(active_ref, cell_ref, ctx_ref, ids_ref, out_ref):
    """out = where(ids >= 0, learning_cell[ids], ctx) on a lane-dense [Rb,128] tile."""
    del active_ref                                    # only consumed by the index_maps
    ctx = ctx_ref[...]                                # (Rb, 128) f32
    ids = ids_ref[...].astype(jnp.int32)              # (Rb, 128); -1 == "not missing"
    rb = ctx.shape[0]
    n_chunks = cell_ref.shape[0]                      # learning_cell padded to (C, 128)

    # Hoisted index decomposition: one AND + one shift for the whole tile.
    lane = ids & (_LANES - 1)                         # in [0,127]; -1 -> 127 (in bounds)
    chunk = ids >> 7                                  # -1 ids -> -1 (matches no chunk)

    def gather_chunk(c, carry):
        # 128-lane chunk of the learning cell, broadcast along sublanes, then a per-row
        # lane gather (XLU dynamic gather) -- no (N,W,M) one-hot intermediate.
        row = jnp.broadcast_to(cell_ref[pl.ds(c, 1), :], (rb, _LANES))
        g = jnp.take_along_axis(
            row, lane, axis=1, mode=lax.GatherScatterMode.PROMISE_IN_BOUNDS)
        if carry is None:
            return g                                  # chunk 0: fixed up by later selects
        return jnp.where(chunk == c, g, carry)

    if n_chunks <= _MAX_UNROLL:
        gathered = None
        for c in range(n_chunks):                     # static unroll (usually C == 1)
            gathered = gather_chunk(c, gathered)
    else:
        # Large learning_cell: keep code size and per-tile VALU/XLU work bounded.
        gathered = lax.fori_loop(1, n_chunks, gather_chunk, gather_chunk(0, None))

    out_ref[...] = jnp.where(ids >= 0, gathered, ctx)


def _fill_slab(ctx2d, ids2d, cell, active, block_rows):
    rows = ctx2d.shape[0]
    m = cell.shape[0]
    n_chunks = max(pl.cdiv(m, _LANES), 1)
    cell2d = jnp.pad(cell.astype(jnp.float32),
                     (0, n_chunks * _LANES - m)).reshape(n_chunks, _LANES)

    # Explicit VMEM budget: 2x-buffered ctx/ids/out blocks + the shared cell table.
    need = (2 * block_rows * _LANES * (4 + 4 + ids2d.dtype.itemsize)
            + 2 * n_chunks * _LANES * 4 + (2 << 20))
    vmem_limit = int(min(max(need, 32 << 20), 64 << 20))

    return pl.pallas_call(
        _fill_kernel,
        out_shape=jax.ShapeDtypeStruct((rows, _LANES), jnp.float32),
        grid_spec=pltpu.PrefetchScalarGridSpec(
            num_scalar_prefetch=1,                     # active-block list lives in SMEM
            grid=(active.shape[0],),                   # only blocks with missing cells
            in_specs=[
                pl.BlockSpec((n_chunks, _LANES), lambda r, blk: (0, 0)),         # cell
                pl.BlockSpec((block_rows, _LANES), lambda r, blk: (blk[r], 0)),  # ctx
                pl.BlockSpec((block_rows, _LANES), lambda r, blk: (blk[r], 0)),  # id map
            ],
            out_specs=pl.BlockSpec((block_rows, _LANES), lambda r, blk: (blk[r], 0)),
        ),
        # In-place fill of the (donated) context slab: inputs are (active, cell, ctx, ids)
        # -> ctx is flat input index 2.  Blocks never visited by the grid keep their
        # original values through the aliased buffer.
        input_output_aliases={2: 0},
        compiler_params=pltpu.CompilerParams(
            dimension_semantics=("parallel",),         # v7x: shards blocks over both TCs
            vmem_limit_bytes=vmem_limit),
    )(active, cell2d, ctx2d, ids2d)


# jit so the context slab is genuinely donated and aliased to the output buffer.
_fill_slab_jit = jax.jit(_fill_slab, static_argnums=(4,), donate_argnums=(0,))


class Args:
    def __init__(self, seed, it, used_regression_index):
        self.seed = seed
        self.iter = it
        self.used_regression_index = used_regression_index


class CMDIJax:
    """JAX/Pallas equivalent of the PyTorch CMDI module (forward pass)."""

    def __init__(self, args, init_data, mask_flag):
        init_data = np.asarray(init_data, dtype=np.float32)
        mask_flag = np.asarray(mask_flag)
        # np.nonzero is row-major => identical ordering to the original nested loop.
        rows, cols = np.nonzero(mask_flag == 1)
        missing_pos = list(zip(rows.tolist(), cols.tolist()))
        missing_num = len(missing_pos)
        self.learning_cell = jnp.asarray(init_data[rows, cols], dtype=jnp.float32)
        self.cell_id_to_missing_pos = dict(zip(range(missing_num), missing_pos))
        self.missing_pos_to_cell_id = dict(zip(missing_pos, range(missing_num)))
        # dense (row, sensor) -> cell_id lookup table (vectorized host glue; -1 == valid)
        table = np.full(mask_flag.shape, -1, dtype=np.int32)
        table[rows, cols] = np.arange(missing_num, dtype=np.int32)
        self._cell_id_table = table
        self._missing_num = missing_num
        self._slab_cache = None

    def invalidate_cache(self):
        """Call if the context / flag / pos lists are mutated in place between forwards."""
        self._slab_cache = None

    # ---- host glue: build the lane-dense slab ONCE per distinct problem -------------
    def _build_slab(self, used, contexts_for_p, missing_flags_for_p, missing_poss_for_p):
        ctx_pieces, id_pieces, shapes = [], [], []
        nrow, ncol = self._cell_id_table.shape
        for p in used:
            ctx = np.asarray(contexts_for_p[p], dtype=np.float32)
            flg = np.asarray(missing_flags_for_p[p], dtype=np.int32)
            pos = np.asarray(missing_poss_for_p[p], dtype=np.int64)       # (N, W, 2)
            r = np.clip(pos[..., 0], 0, nrow - 1)                         # placeholder pos may be junk
            c = np.clip(pos[..., 1], 0, ncol - 1)
            ids = np.where(flg == 1, self._cell_id_table[r, c],
                           np.int32(-1)).astype(np.int32)
            shapes.append(ctx.shape)
            ctx_pieces.append(ctx.reshape(-1))
            id_pieces.append(ids.reshape(-1))

        ctx_flat = np.concatenate(ctx_pieces)
        ids_flat = np.concatenate(id_pieces)
        total = int(ctx_flat.size)

        # Lane-dense [rows, 128] layout.  rows is bucketed at ~12.5% granularity so
        # varying slab sizes reuse a small set of compiled shapes; block_rows is chosen
        # so (a) tail padding stays small, (b) blocks stay <= _MAX_BLOCK_ROWS, and
        # (c) slabs > 1024 rows always yield >= 2 grid steps (both v7x TCs get work).
        raw_rows = max(pl.cdiv(total, _LANES), 1)
        quantum = max(pl.next_power_of_2(raw_rows) // 8, _SUBLANES)
        rows = _round_up(raw_rows, quantum)
        n_blocks = pl.cdiv(rows, _MAX_BLOCK_ROWS)
        if rows > 1024:
            n_blocks = max(n_blocks, 2)
        block_rows = _round_up(pl.cdiv(rows, n_blocks), _SUBLANES)
        rows = _round_up(rows, block_rows)
        padded = rows * _LANES

        # int16 id map when it fits: 10 B/elem HBM traffic instead of 12 on a mem-bound kernel.
        id_dtype = np.int16 if self._missing_num < 32768 else np.int32

        ctx_pad = np.zeros(padded, dtype=np.float32)
        ctx_pad[:total] = ctx_flat
        ids_pad = np.full(padded, -1, dtype=id_dtype)
        ids_pad[:total] = ids_flat.astype(id_dtype)
        ctx2d = ctx_pad.reshape(rows, _LANES)
        ids2d = ids_pad.reshape(rows, _LANES)

        # Sparse grid: only blocks containing at least one missing cell are processed;
        # untouched blocks keep their values via the aliased in-place output.
        nb = rows // block_rows
        blk_has_missing = (ids2d.reshape(nb, block_rows * _LANES) >= 0).any(axis=1)
        active = np.nonzero(blk_has_missing)[0].astype(np.int32)
        n_active = int(active.size)
        if n_active > 0:
            # Bucket the grid length too (pad with repeats of the last block: idempotent,
            # deduped by the pipeline since the repeated indices are consecutive).
            q = max(pl.next_power_of_2(n_active) // 8, 1)
            pad = _round_up(n_active, q) - n_active
            if pad:
                active = np.concatenate([active, np.full(pad, active[-1], np.int32)])

        return dict(
            ctx_obj=contexts_for_p, flag_obj=missing_flags_for_p, pos_obj=missing_poss_for_p,
            used=tuple(used), shapes=shapes, total=total, block_rows=int(block_rows),
            ctx_dev=jnp.asarray(ctx2d),
            ids_dev=jnp.asarray(ids2d),
            active_dev=jnp.asarray(active) if n_active else None,
        )

    def forward(self, args, contexts_for_p, missing_flags_for_p, missing_poss_for_p):
        n_sensors = len(contexts_for_p)
        used = tuple(p for p in range(n_sensors) if p in args.used_regression_index)
        filled_contexts = [None] * n_sensors
        if not used:
            return filled_contexts, self.learning_cell, self.cell_id_to_missing_pos

        cache = self._slab_cache
        hit = (cache is not None
               and cache["ctx_obj"] is contexts_for_p
               and cache["flag_obj"] is missing_flags_for_p
               and cache["pos_obj"] is missing_poss_for_p
               and cache["used"] == used)
        if not hit:
            cache = self._build_slab(used, contexts_for_p, missing_flags_for_p,
                                     missing_poss_for_p)
            self._slab_cache = cache

        if cache["active_dev"] is None:                # nothing to impute
            filled2d = cache["ctx_dev"]
        else:
            filled2d = _fill_slab_jit(cache["ctx_dev"], cache["ids_dev"],
                                      self.learning_cell, cache["active_dev"],
                                      cache["block_rows"])
            # INVARIANT: the filled slab is reused as the next call's ctx.  This is safe
            # only because every missing cell is fully rewritten from learning_cell on
            # every call and non-missing cells are bit-identical copies of the original
            # context.  If the caller mutates the context tensors in place, call
            # invalidate_cache().
            cache["ctx_dev"] = filled2d

        filled = filled2d.reshape(-1)
        offset = 0
        for p, shape in zip(cache["used"], cache["shapes"]):
            size = int(np.prod(shape))
            filled_contexts[p] = filled[offset:offset + size].reshape(shape)
            offset += size
        return filled_contexts, self.learning_cell, self.cell_id_to_missing_pos


if __name__ == "__main__":
    key = jax.random.PRNGKey(0)

    # global measurement table: 16 time rows x 4 sensors
    num_rows, num_sensors = 16, 4
    k0, k1, k2 = jax.random.split(key, 3)
    init_data = np.asarray(jax.random.normal(k0, (num_rows, num_sensors)),
                           dtype=np.float32)
    mask_flag = np.asarray(
        jax.random.bernoulli(k1, 0.3, (num_rows, num_sensors)), dtype=np.int32)
    if mask_flag.sum() == 0:  # guard: need at least one missing cell
        mask_flag[0, 0] = 1

    args = Args(seed=0, it=0, used_regression_index=[0, 2, 3])
    model = CMDIJax(args, init_data, mask_flag)

    # per-sensor regression contexts: N=8 rows, window W=8
    N, W = 8, 8
    global_missing = [(i, s) for i in range(num_rows) for s in range(num_sensors)
                      if mask_flag[i, s] == 1]

    contexts_for_p, missing_flags_for_p, missing_poss_for_p = [], [], []
    gcount = 0
    for p in range(num_sensors):
        kc, kf, k2 = jax.random.split(k2, 3)
        ctx = np.asarray(jax.random.normal(kc, (N, W)), dtype=np.float32)
        flg = np.asarray(jax.random.bernoulli(kf, 0.3, (N, W)), dtype=np.int32)
        pos = []
        for i in range(N):
            row_pos = []
            for j in range(W):
                if flg[i, j] == 1:
                    row_pos.append(global_missing[gcount % len(global_missing)])
                    gcount += 1
                else:
                    row_pos.append(global_missing[0])  # placeholder, never dereferenced
            pos.append(row_pos)
        contexts_for_p.append(ctx)
        missing_flags_for_p.append(flg)
        missing_poss_for_p.append(pos)

    def numpy_reference(cell_np):
        refs = []
        for p in range(num_sensors):
            if p not in args.used_regression_index:
                refs.append(None)
                continue
            ref = np.array(contexts_for_p[p], dtype=np.float32)
            flg = missing_flags_for_p[p]
            pos = missing_poss_for_p[p]
            for i in range(N):
                for j in range(W):
                    if flg[i, j] == 1:
                        ref[i, j] = cell_np[model.missing_pos_to_cell_id[pos[i][j]]]
            refs.append(ref)
        return refs

    # --- call 1: builds the device-resident slab and runs the kernel
    filled_contexts, learning_cell, cell_id_to_missing_pos = model.forward(
        args, contexts_for_p, missing_flags_for_p, missing_poss_for_p)
    for fc in filled_contexts:
        if fc is not None:
            jax.block_until_ready(fc)
    refs = numpy_reference(np.asarray(learning_cell))
    for p in range(num_sensors):
        if refs[p] is None:
            assert filled_contexts[p] is None
        else:
            np.testing.assert_allclose(np.asarray(filled_contexts[p]), refs[p],
                                       rtol=1e-6, atol=1e-6)

    # --- simulate one optimizer step, then call 2: exercises the cache-hit path where the
    #     previously filled slab is fed back as ctx and only learning_cell is re-uploaded.
    model.learning_cell = model.learning_cell + 0.5
    filled_contexts2, learning_cell2, _ = model.forward(
        args, contexts_for_p, missing_flags_for_p, missing_poss_for_p)
    for fc in filled_contexts2:
        if fc is not None:
            jax.block_until_ready(fc)
    refs2 = numpy_reference(np.asarray(learning_cell2))
    for p in range(num_sensors):
        if refs2[p] is None:
            assert filled_contexts2[p] is None
        else:
            np.testing.assert_allclose(np.asarray(filled_contexts2[p]), refs2[p],
                                       rtol=1e-6, atol=1e-6)

    jax.block_until_ready(learning_cell2)
    print("KERNEL_OK")
</pallas_src>

<mosaic_0001>
module attributes {stable_mosaic.version = 11 : i64} {
  func.func @_fill_kernel(%arg0: i32, %arg1: memref<1xi32, #tpu.memory_space<smem>>, %arg2: memref<1x128xf32, #tpu.memory_space<vmem>>, %arg3: memref<16x128xf32, #tpu.memory_space<vmem>>, %arg4: memref<16x128xi16, #tpu.memory_space<vmem>>, %arg5: memref<16x128xf32, #tpu.memory_space<vmem>>) attributes {dimension_semantics = [#tpu.dimension_semantics<parallel>], iteration_bounds = array<i64: 1>, scalar_prefetch = 1 : i64, scratch_operands = 0 : i64, tpu.core_type = #tpu.core_type<tc>, window_params = [{pipeline_mode = #tpu.pipeline_mode<synchronous>, transform_indices = @transform_0, window_bounds = array<i64: 1, 128>}, {transform_indices = @transform_1, window_bounds = array<i64: 16, 128>}, {transform_indices = @transform_2, window_bounds = array<i64: 16, 128>}, {transform_indices = @transform_3, window_bounds = array<i64: 16, 128>}]} {
    %c0 = arith.constant 0 : index
    %c0_0 = arith.constant 0 : index
    %0 = vector.load %arg3[%c0, %c0_0] : memref<16x128xf32, #tpu.memory_space<vmem>>, vector<16x128xf32>
    %c0_1 = arith.constant 0 : index
    %c0_2 = arith.constant 0 : index
    %1 = vector.load %arg4[%c0_1, %c0_2] : memref<16x128xi16, #tpu.memory_space<vmem>>, vector<16x128xi16>
    %2 = arith.extsi %1 : vector<16x128xi16> to vector<16x128xi32>
    %c127_i32 = arith.constant 127 : i32
    %3 = vector.broadcast %c127_i32 : i32 to vector<16x128xi32>
    %4 = arith.andi %2, %3 : vector<16x128xi32>
    %c0_3 = arith.constant 0 : index
    %c0_4 = arith.constant 0 : index
    %5 = vector.load %arg2[%c0_3, %c0_4] : memref<1x128xf32, #tpu.memory_space<vmem>>, vector<1x128xf32>
    %6 = vector.shape_cast %5 : vector<1x128xf32> to vector<1x128xf32>
    %7 = vector.broadcast %6 : vector<1x128xf32> to vector<16x128xf32>
    %c0_i32 = arith.constant 0 : i32
    %8 = vector.broadcast %c0_i32 : i32 to vector<16x128xi32>
    %9 = arith.cmpi slt, %4, %8 : vector<16x128xi32>
    %c128_i32 = arith.constant 128 : i32
    %10 = vector.broadcast %c128_i32 : i32 to vector<16x128xi32>
    %11 = arith.addi %4, %10 : vector<16x128xi32>
    %12 = arith.select %9, %11, %4 : vector<16x128xi1>, vector<16x128xi32>
    %13 = vector.shape_cast %12 : vector<16x128xi32> to vector<16x128x1xi32>
    %14 = vector.shape_cast %13 : vector<16x128x1xi32> to vector<16x128xi32>
    %15 = tpu.dynamic_gather %7[%14] in [1] : vector<16x128xf32>, vector<16x128xi32> -> vector<16x128xf32>
    %c0_i32_5 = arith.constant 0 : i32
    %16 = vector.broadcast %c0_i32_5 : i32 to vector<16x128xi32>
    %17 = arith.cmpi sge, %2, %16 : vector<16x128xi32>
    %18 = arith.select %17, %15, %0 : vector<16x128xi1>, vector<16x128xf32>
    %c0_6 = arith.constant 0 : index
    %c0_7 = arith.constant 0 : index
    %19 = vector.load %arg5[%c0_6, %c0_7] : memref<16x128xf32, #tpu.memory_space<vmem>>, vector<16x128xf32>
    tpu.vector_store %arg5[%c0_6, %c0_7], %18 {strides = array<i32>} : memref<16x128xf32, #tpu.memory_space<vmem>>, vector<16x128xf32>,
    return
  }
  func.func @transform_0(%arg0: i32, %arg1: memref<1xi32, #tpu.memory_space<smem>>) -> (i32, i32) {
    %c0_i32 = arith.constant 0 : i32
    %c0_i32_0 = arith.constant 0 : i32
    %c0_i32_1 = arith.constant 0 : i32
    return %c0_i32, %c0_i32_0 : i32, i32
  }
  func.func @transform_1(%arg0: i32, %arg1: memref<1xi32, #tpu.memory_space<smem>>) -> (i32, i32) {
    %0 = arith.index_cast %arg0 : i32 to index
    %1 = memref.load %arg1[%0] : memref<1xi32, #tpu.memory_space<smem>>
    %c0_i32 = arith.constant 0 : i32
    %c0_i32_0 = arith.constant 0 : i32
    return %1, %c0_i32 : i32, i32
  }
  func.func @transform_2(%arg0: i32, %arg1: memref<1xi32, #tpu.memory_space<smem>>) -> (i32, i32) {
    %0 = arith.index_cast %arg0 : i32 to index
    %1 = memref.load %arg1[%0] : memref<1xi32, #tpu.memory_space<smem>>
    %c0_i32 = arith.constant 0 : i32
    %c0_i32_0 = arith.constant 0 : i32
    return %1, %c0_i32 : i32, i32
  }
  func.func @transform_3(%arg0: i32, %arg1: memref<1xi32, #tpu.memory_space<smem>>) -> (i32, i32) {
    %0 = arith.index_cast %arg0 : i32 to index
    %1 = memref.load %arg1[%0] : memref<1xi32, #tpu.memory_space<smem>>
    %c0_i32 = arith.constant 0 : i32
    %c0_i32_0 = arith.constant 0 : i32
    return %1, %c0_i32 : i32, i32
  }
}

</mosaic_0001>

<bundles_post_ra>
// kernel: _fill_slab.1
= control target key start
LH: loop header
LB: loop body
LE: loop exit
PB: predicated region body
PF: predicated region fallthrough
CT: control target
= control target key end

     0   :  { %10 = vsyncpa [#allocation5], 0  ;;  %s297_s0 = inlined_call_operand.<no memory space> [shape: s32[1], index: 0, kind: input, shape index: {}]   ;;  %s298_s1 = inlined_call_operand.vmem [shape: f32[1,128], index: 1, kind: input, shape index: {}]   ;;  %s299_s2 = inlined_call_operand.hbm [shape: f32[16,128], index: 2, kind: input, shape index: {}, may-alias: {2,4}]   ;;  %s300_s3 = inlined_call_operand.hbm [shape: s16[16,128], index: 3, kind: input, shape index: {}]   ;;  %s301_s4 = inlined_call_operand.hbm [shape: f32[16,128], index: 4, kind: output, shape index: {}, may-alias: {2,4}]  }
   0x1   :  { %11 = vsyncpa [#allocation8], 0 }
   0x2   :  { %12 = vsyncpa [#allocation6], 0  ;;  %s127_s17 = sshll.u32 %s297_s0, 8  ;;  %s215_s23 = smov [#allocation4]  }
   0x3   :  { %s23_s22 = scalar_lea.hbm %s299_s2, %s127_s17  ;;  %s24_s24 = sshll.u32 %s215_s23, 4  ;;  %s25_s24 = int_to_ptr.vmem [resolvable:$true] %s24_s24 }
   0x4   :  { %s128_s27 = sshll.u32 %s297_s0, 7  ;;  %s143_s28 = scalar_lea.hbm %s23_s22, 256 }
   0x5   :  { %p144_p0 = scmp.ne.s32.totalorder %s23_s22, %s143_s28  ;;  %s145_s5 = scalar_lea.hbm %s299_s2, 256 }
   0x6   :  { %p146_p1 = scmp.lt.s32.totalorder %s23_s22, %s299_s2  ;;  %p147_p2 = scmp.lt.s32.totalorder %s145_s5, %s143_s28 }
   0x8   :  { %p148_p3 = por %p147_p2, %p146_p1 }
   0xa   :  { %p149_p4 = pnand %p148_p3, %p144_p0 }
   0xc   :  { %152 = shalt.err (!%p149_p4)
}
   0xd   :  { %s153_s8 = scalar_lea.vmem %s25_s24, 256  ;;  %p158_p6 = scmp.lt.s32.totalorder %s25_s24, %s25_s24 }
   0xe   :  { %p154_p5 = scmp.ne.s32.totalorder %s25_s24, %s153_s8  ;;  %p159_p7 = scmp.lt.s32.totalorder %s153_s8, %s153_s8 }
  0x10   :  { %p160_p8 = por %p159_p7, %p158_p6 }
  0x12   :  { %p161_p9 = pnand %p160_p8, %p154_p5 }
  0x14   :  { %164 = shalt.err (!%p161_p9)
}
  0x15   :  { %s216_s9 = smov 128   ;;  %s217_s10 = smov 8  }
  0x16   :  { %30 = dma.hbm_to_vmem [thread:$0]  %s23_s22, 256, %s25_s24, [#allocation5], %s216_s9, %s216_s9, %s217_s10  }
  0x17   :  { %s39_s2 = scalar_lea.hbm %s300_s3, %s128_s27  ;;  %s218_s13 = smov [#allocation7]  }
  0x18   :  { %s40_s14 = sshll.u32 %s218_s13, 4  ;;  %s165_s15 = scalar_lea.hbm %s39_s2, 128  ;;  %s41_s14 = int_to_ptr.vmem [resolvable:$true] %s40_s14 }
  0x19   :  { %p166_p10 = scmp.ne.s32.totalorder %s39_s2, %s165_s15  ;;  %s167_s19 = scalar_lea.hbm %s300_s3, 128 }
  0x1a   :  { %p168_p11 = scmp.lt.s32.totalorder %s39_s2, %s300_s3  ;;  %p169_p12 = scmp.lt.s32.totalorder %s167_s19, %s165_s15 }
  0x1c   :  { %p170_p13 = por %p169_p12, %p168_p11 }
  0x1e   :  { %p171_p0 = pnand %p170_p13, %p166_p10 }
  0x20   :  { %174 = shalt.err (!%p171_p0)
}
  0x21   :  { %s175_s22 = scalar_lea.vmem %s41_s14, 128  ;;  %p180_p2 = scmp.lt.s32.totalorder %s41_s14, %s41_s14 }
  0x22   :  { %p176_p1 = scmp.ne.s32.totalorder %s41_s14, %s175_s22  ;;  %p181_p3 = scmp.lt.s32.totalorder %s175_s22, %s175_s22 }
  0x24   :  { %p182_p4 = por %p181_p3, %p180_p2 }
  0x26   :  { %p183_p5 = pnand %p182_p4, %p176_p1 }
  0x28   :  { %186 = shalt.err (!%p183_p5)
}
  0x29   :  { %s219_s23 = smov 64   ;;  %s220_s24 = smov 4  }
  0x2a   :  { %46 = dma.hbm_to_vmem [thread:$0]  %s39_s2, 128, %s41_s14, [#allocation8], %s219_s23, %s219_s23, %s220_s24  }
  0x2b   :  { %209 = dma.done.wait [#allocation5], 256  }
  0x2c   :  { %210 = vsyncadd [#allocation5], 4294967040 }
  0x2d   :  { %211 = dma.done.wait [#allocation8], 128  }
  0x2e   :  { %212 = vsyncadd [#allocation8], 4294967168  ;;  %v131_v0 = vld [vmem:[#allocation7] sm:$0xff]   ;;  %v124_v7 = vld [vmem:[%s298_s1] ss:$0 sm:$0xff]  ;;  %s221_s26 = smov [#allocation9]   ;;  %s100_s5 = scalar_lea.hbm %s301_s4, %s127_s17 }
  0x2f   :  { %v132_v1 = vunpack.c.l.b16 %v131_v0  ;;  %v133_v2 = vunpack.c.h.b16 %v131_v0  ;;  %v59_v10 = vld [vmem:[#allocation4] sm:$0xff]  ;;  %s101_s27 = sshll.u32 %s221_s26, 4  ;;  %v60_v13 = vld [vmem:[#allocation4 + $0x8] sm:$0xff]  ;;  %s102_s27 = int_to_ptr.vmem [resolvable:$true] %s101_s27 }
  0x30   :  { %s187_s6 = scalar_lea.vmem %s102_s27, 256  ;;  %p192_p7 = scmp.lt.s32.totalorder %s102_s27, %s102_s27 }
  0x31   :  { %v65_v3 = vand.u32 127, %v132_v1  ;;  %v66_v5 = vand.u32 127, %v133_v2  ;;  %vm86_vm2 = vcmp.ge.s32.totalorder %v132_v1, 0  ;;  %vm87_vm3 = vcmp.ge.s32.totalorder %v133_v2, 0  ;;  %p188_p6 = scmp.ne.s32.totalorder %s102_s27, %s187_s6  ;;  %p193_p8 = scmp.lt.s32.totalorder %s187_s6, %s187_s6 }
  0x33   :  { %vm74_vm0 = vcmp.lt.s32.totalorder %v65_v3, 0  ;;  %v76_v4 = vadd.s32 128, %v65_v3  ;;  %v77_v8 = vadd.s32 128, %v66_v5  ;;  %vm75_vm1 = vcmp.lt.s32.totalorder %v66_v5, 0  ;;  %p194_p9 = por %p193_p8, %p192_p7 }
  0x35   :  { %v78_v6 = vsel %vm74_vm0, %v76_v4, %v65_v3  ;;  %v79_v9 = vsel %vm75_vm1, %v77_v8, %v66_v5  ;;  %p195_p10 = pnand %p194_p9, %p188_p6 }
  0x36   :  { %141 = vset.pattern.permute.xlu0 %v78_v6 }
  0x3a   :  { %81 = vperm.xlu0 %141, %v124_v7  }
  0x3e   :  { %142 = vset.pattern.permute.xlu0 %v79_v9 }
  0x42   :  { %84 = vperm.xlu0 %142, %v124_v7  }
  0xb5   :  { %v82_v11 = vpop.permute.xlu0 %81 }
  0xb6   :  { %v88_v12 = vsel %vm86_vm2, %v82_v11, %v59_v10 }
  0xb7   :  { %90 = vst [vmem:[#allocation9] sm:$0xff] %v88_v12 }
  0xbd   :  { %v85_v14 = vpop.permute.xlu0 %84 }
  0xbe   :  { %v89_v15 = vsel %vm87_vm3, %v85_v14, %v60_v13 }
  0xbf   :  { %91 = vst [vmem:[#allocation9 + $0x8] sm:$0xff] %v89_v15 }
  0xc0   :  { %198 = shalt.err (!%p195_p10)
}
  0xc1   :  { %s199_s7 = scalar_lea.hbm %s100_s5, 256  ;;  %s201_s0 = scalar_lea.hbm %s301_s4, 256 }
  0xc2   :  { %p200_p11 = scmp.ne.s32.totalorder %s100_s5, %s199_s7  ;;  %p202_p12 = scmp.lt.s32.totalorder %s100_s5, %s301_s4 }
  0xc3   :  { %p203_p13 = scmp.lt.s32.totalorder %s201_s0, %s199_s7 }
  0xc5   :  { %p204_p0 = por %p203_p13, %p202_p12 }
  0xc7   :  { %p205_p1 = pnand %p204_p0, %p200_p11 }
  0xc9   :  { %208 = shalt.err (!%p205_p1)
}
  0xca   :  { %107 = dma.vmem_to_hbm [thread:$0]  %s102_s27, 256, %s100_s5, [#allocation6], %s216_s9, %s216_s9, %s217_s10  }
  0xcb   :  { %213 = dma.done.wait [#allocation6], 256  }
  0xcc   :  { %214 = vsyncadd [#allocation6], 4294967040 }
  0xcd   :  { %111 = vsyncpa [#allocation5], 1 }
  0xce   :  { %112 = vsyncpa [#allocation8], 1 }
  0xcf   :  { %113 = vsyncpa [#allocation6], 1 }

</bundles_post_ra>
